<compile_context>
chip_gen: v5e
topology: v5e:2x2
jax: 0.10.0
libtpu: 0.0.40
codegen_flags: <defaults>
</compile_context>

<pallas_src>
import math

import jax
import jax.numpy as jnp
from jax.experimental import pallas as pl
from jax.experimental.pallas import tpu as pltpu

LANE = 128
VMEM_LIMIT = 40 * 1024 * 1024   # < v7x's 64 MiB physical, > 16/32 MiB defaults


def _round_up(x, m):
    return ((x + m - 1) // m) * m


# ----------------------------- Pallas kernels ------------------------------

def _gin_fused_kernel(eps_ref, x0_ref, a_ref, p_ref,
                      w1_ref, b1_ref, w2_ref, b2_ref,
                      wf1_ref, bf1_ref, wf2_ref, bf2_ref,
                      out_ref, x_ref):
    """Whole GIN forward with A, P and activations resident in VMEM.

    grid = (num_layers,).  All large operands use constant-index BlockSpecs
    (DMA'd from HBM once); per-layer weights are indexed by the layer id.

      l == 0     : x <- input features
      every l    : x <- relu(relu(((1+eps_l)*x + A @ x) @ W1_l + b1_l) @ W2_l + b2_l)
      l == last  : out <- (relu((P @ x) @ Wf1 + bf1)) @ Wf2 + bf2
    """
    l = pl.program_id(0)

    @pl.when(l == 0)
    def _load_features():
        x_ref[...] = x0_ref[...]

    x = x_ref[...]                                           # bf16 (N, C)
    z = (1.0 + eps_ref[l]) * x.astype(jnp.float32)
    z = z + jnp.dot(a_ref[...], x, preferred_element_type=jnp.float32)
    h1 = jnp.dot(z.astype(jnp.bfloat16), w1_ref[...],
                 preferred_element_type=jnp.float32) + b1_ref[...]
    h1 = jnp.maximum(h1, 0.0)                                # ReLU
    h2 = jnp.dot(h1.astype(jnp.bfloat16), w2_ref[...],
                 preferred_element_type=jnp.float32) + b2_ref[...]
    x_ref[...] = jnp.maximum(h2, 0.0).astype(x_ref.dtype)    # ReLU, bf16

    @pl.when(l == pl.num_programs(0) - 1)
    def _pool_and_head():
        pooled = jnp.dot(p_ref[...], x_ref[...],
                         preferred_element_type=jnp.float32)
        h = jnp.dot(pooled.astype(jnp.bfloat16), wf1_ref[...],
                    preferred_element_type=jnp.float32) + bf1_ref[...]
        h = jnp.maximum(h, 0.0)                              # ReLU
        out_ref[...] = jnp.dot(h.astype(jnp.bfloat16), wf2_ref[...],
                               preferred_element_type=jnp.float32) + bf2_ref[...]


def _gin_conv_kernel(eps_ref, a_ref, xsrc_ref, xdst_ref,
                     w1_ref, b1_ref, w2_ref, b2_ref, y_ref, acc_ref):
    """One GINConv layer, gridded over (dst tiles, src tiles).

      k == 0     : acc  = (1 + eps) * x_dst                     (self term)
      every k    : acc += A[i, k] @ x_src[k]    (bf16 MXU, f32 accumulate)
      k == last  : y    = relu(relu(acc @ W1 + b1) @ W2 + b2)   (bf16 out)
    """
    k = pl.program_id(1)

    @pl.when(k == 0)
    def _init():
        acc_ref[...] = (1.0 + eps_ref[0]) * xdst_ref[...].astype(jnp.float32)

    acc_ref[...] += jnp.dot(a_ref[...], xsrc_ref[...],
                            preferred_element_type=jnp.float32)

    @pl.when(k == pl.num_programs(1) - 1)
    def _finalize():
        h1 = jnp.dot(acc_ref[...].astype(jnp.bfloat16), w1_ref[...],
                     preferred_element_type=jnp.float32) + b1_ref[...]
        h1 = jnp.maximum(h1, 0.0)                                  # ReLU
        h2 = jnp.dot(h1.astype(jnp.bfloat16), w2_ref[...],
                     preferred_element_type=jnp.float32) + b2_ref[...]
        y_ref[...] = jnp.maximum(h2, 0.0).astype(y_ref.dtype)      # ReLU


def _pool_final_kernel(p_ref, x_ref, wf1_ref, bf1_ref, wf2_ref, bf2_ref,
                       out_ref, acc_ref):
    """global_add_pool (reduction over node tiles) + final MLP at the end."""
    k = pl.program_id(0)

    @pl.when(k == 0)
    def _init():
        acc_ref[...] = jnp.zeros_like(acc_ref)

    acc_ref[...] += jnp.dot(p_ref[...], x_ref[...],
                            preferred_element_type=jnp.float32)

    @pl.when(k == pl.num_programs(0) - 1)
    def _finalize():
        h = jnp.dot(acc_ref[...].astype(jnp.bfloat16), wf1_ref[...],
                    preferred_element_type=jnp.float32) + bf1_ref[...]
        h = jnp.maximum(h, 0.0)                                    # ReLU
        out_ref[...] = jnp.dot(h.astype(jnp.bfloat16), wf2_ref[...],
                               preferred_element_type=jnp.float32) + bf2_ref[...]


# ------------------------------ pallas_call wrappers ------------------------

def gin_fused(x0, adj, pool_mat, params):
    """All layers + pool + head in one kernel; A / P / activations VMEM-resident."""
    n_pad = adj.shape[0]
    g_pad = pool_mat.shape[0]
    c_act = x0.shape[1]
    c_mid = params["w1"].shape[2]
    L = int(params["w1"].shape[0])

    flops = (2 * L * (n_pad * n_pad * c_act
                      + n_pad * c_act * c_mid + n_pad * c_mid * c_act)
             + 2 * (g_pad * n_pad * c_act + g_pad * c_act * c_act
                    + g_pad * c_act * LANE))
    bytes_accessed = (2 * n_pad * n_pad + 2 * n_pad * c_act + 2 * g_pad * n_pad
                      + L * (4 * c_act * c_mid + 4 * (c_mid + c_act))
                      + 2 * c_act * (c_act + LANE) + 4 * g_pad * LANE)

    return pl.pallas_call(
        _gin_fused_kernel,
        out_shape=jax.ShapeDtypeStruct((g_pad, LANE), jnp.float32),
        grid_spec=pltpu.PrefetchScalarGridSpec(
            num_scalar_prefetch=0,
            grid=(L,),
            in_specs=[
                pl.BlockSpec(memory_space=pltpu.MemorySpace.SMEM),      # eps (L,)
                pl.BlockSpec((n_pad, c_act), lambda l: (0, 0)),         # x0 (bf16)
                pl.BlockSpec((n_pad, n_pad), lambda l: (0, 0)),         # A  (bf16, resident)
                pl.BlockSpec((g_pad, n_pad), lambda l: (0, 0)),         # P  (bf16, resident)
                pl.BlockSpec((None, c_act, c_mid), lambda l: (l, 0, 0)),  # W1[l]
                pl.BlockSpec((None, 1, c_mid), lambda l: (l, 0, 0)),      # b1[l]
                pl.BlockSpec((None, c_mid, c_act), lambda l: (l, 0, 0)),  # W2[l]
                pl.BlockSpec((None, 1, c_act), lambda l: (l, 0, 0)),      # b2[l]
                pl.BlockSpec((c_act, c_act), lambda l: (0, 0)),         # Wf1
                pl.BlockSpec((1, c_act), lambda l: (0, 0)),             # bf1
                pl.BlockSpec((c_act, LANE), lambda l: (0, 0)),          # Wf2
                pl.BlockSpec((1, LANE), lambda l: (0, 0)),              # bf2
            ],
            out_specs=pl.BlockSpec((g_pad, LANE), lambda l: (0, 0)),
            scratch_shapes=[pltpu.VMEM((n_pad, c_act), jnp.bfloat16)],  # resident x
        ),
        compiler_params=pltpu.CompilerParams(
            dimension_semantics=("arbitrary",),
            vmem_limit_bytes=VMEM_LIMIT),
        cost_estimate=pl.CostEstimate(flops=flops, transcendentals=0,
                                      bytes_accessed=bytes_accessed),
    )(params["eps"], x0, adj, pool_mat,
      params["w1"], params["b1"], params["w2"], params["b2"],
      params["wf1"], params["bf1"], params["wf2"], params["bf2"])


def gin_conv(x_bf16, adj_bf16, eps, w1, b1, w2, b2, *, tm, tk):
    n_pad = adj_bf16.shape[0]
    c_act = x_bf16.shape[1]
    c_mid = w1.shape[1]
    assert n_pad % tm == 0 and n_pad % tk == 0
    assert w1.shape[0] == c_act and w2.shape == (c_mid, c_act)

    grid = (n_pad // tm, n_pad // tk)
    flops = 2 * (n_pad * n_pad * c_act
                 + n_pad * c_act * c_mid + n_pad * c_mid * c_act)
    bytes_accessed = (2 * n_pad * n_pad                          # A (bf16)
                      + (n_pad // tm) * 2 * n_pad * c_act        # x_src re-stream
                      + 2 * n_pad * c_act                        # x_dst
                      + 2 * n_pad * c_act                        # y out (bf16)
                      + 4 * c_act * c_mid + 4 * (c_mid + c_act))
    return pl.pallas_call(
        _gin_conv_kernel,
        out_shape=jax.ShapeDtypeStruct((n_pad, c_act), jnp.bfloat16),
        grid_spec=pltpu.PrefetchScalarGridSpec(
            num_scalar_prefetch=0,
            grid=grid,
            in_specs=[
                pl.BlockSpec(memory_space=pltpu.MemorySpace.SMEM),   # eps (1,)
                pl.BlockSpec((tm, tk), lambda i, k: (i, k)),         # A tile (bf16)
                pl.BlockSpec((tk, c_act), lambda i, k: (k, 0)),      # x_src (bf16)
                pl.BlockSpec((tm, c_act), lambda i, k: (i, 0)),      # x_dst (bf16)
                pl.BlockSpec((c_act, c_mid), lambda i, k: (0, 0)),   # W1 (bf16)
                pl.BlockSpec((1, c_mid), lambda i, k: (0, 0)),       # b1 (f32)
                pl.BlockSpec((c_mid, c_act), lambda i, k: (0, 0)),   # W2 (bf16)
                pl.BlockSpec((1, c_act), lambda i, k: (0, 0)),       # b2 (f32)
            ],
            out_specs=pl.BlockSpec((tm, c_act), lambda i, k: (i, 0)),
            scratch_shapes=[pltpu.VMEM((tm, c_act), jnp.float32)],
        ),
        compiler_params=pltpu.CompilerParams(
            dimension_semantics=("parallel", "arbitrary"),
            vmem_limit_bytes=VMEM_LIMIT),
        cost_estimate=pl.CostEstimate(flops=flops, transcendentals=0,
                                      bytes_accessed=bytes_accessed),
    )(eps, adj_bf16, x_bf16, x_bf16, w1, b1, w2, b2)


def pool_and_final_mlp(pool_mat, x, wf1, bf1, wf2, bf2, *, tk):
    g_pad, n_pad = pool_mat.shape
    c_act = x.shape[1]
    c_out = wf2.shape[1]
    assert n_pad % tk == 0 and wf1.shape[0] == c_act

    grid = (n_pad // tk,)
    flops = 2 * (g_pad * n_pad * c_act + g_pad * c_act * c_act
                 + g_pad * c_act * c_out)
    bytes_accessed = (2 * g_pad * n_pad + 2 * n_pad * c_act
                      + 2 * c_act * (c_act + c_out) + 4 * g_pad * c_out)
    return pl.pallas_call(
        _pool_final_kernel,
        out_shape=jax.ShapeDtypeStruct((g_pad, c_out), jnp.float32),
        grid_spec=pltpu.PrefetchScalarGridSpec(
            num_scalar_prefetch=0,
            grid=grid,
            in_specs=[
                pl.BlockSpec((g_pad, tk), lambda k: (0, k)),         # P tile (bf16)
                pl.BlockSpec((tk, c_act), lambda k: (k, 0)),         # X tile (bf16)
                pl.BlockSpec((c_act, c_act), lambda k: (0, 0)),      # Wf1 (bf16)
                pl.BlockSpec((1, c_act), lambda k: (0, 0)),          # bf1 (f32)
                pl.BlockSpec((c_act, c_out), lambda k: (0, 0)),      # Wf2 (bf16)
                pl.BlockSpec((1, c_out), lambda k: (0, 0)),          # bf2 (f32)
            ],
            out_specs=pl.BlockSpec((g_pad, c_out), lambda k: (0, 0)),
            scratch_shapes=[pltpu.VMEM((g_pad, c_act), jnp.float32)],
        ),
        compiler_params=pltpu.CompilerParams(
            dimension_semantics=("arbitrary",),
            vmem_limit_bytes=VMEM_LIMIT),
        cost_estimate=pl.CostEstimate(flops=flops, transcendentals=0,
                                      bytes_accessed=bytes_accessed),
    )(pool_mat, x, wf1, bf1, wf2, bf2)


# ------------------------------ Model wrapper -------------------------------

def init_linear(key, fan_in, fan_out):
    """PyTorch nn.Linear-style uniform init; weight stored as [in, out]."""
    kw, kb = jax.random.split(key)
    bound = 1.0 / float(fan_in) ** 0.5
    w = jax.random.uniform(kw, (fan_in, fan_out), jnp.float32, -bound, bound)
    b = jax.random.uniform(kb, (1, fan_out), jnp.float32, -bound, bound)
    return w, b


def _pad2d(a, rows, cols):
    """Zero-pad a 2-D array up to (rows, cols)."""
    out = jnp.zeros((rows, cols), a.dtype)
    return out.at[: a.shape[0], : a.shape[1]].set(a)


def init_gin_params(key, in_channels, hidden_channels, num_layers, out_channels):
    """Weights padded to lane-dense widths; matmul weights bf16, biases f32."""
    c_act = _round_up(max(in_channels, hidden_channels, out_channels), LANE)
    c_mid = _round_up(2 * hidden_channels, LANE)

    dims = [(in_channels, 2 * hidden_channels, hidden_channels)]
    dims += [(hidden_channels, 2 * hidden_channels, hidden_channels)] * max(num_layers - 2, 0)
    dims += [(hidden_channels, 2 * hidden_channels, out_channels)]

    w1s, b1s, w2s, b2s = [], [], [], []
    for (ci, ch, co) in dims:
        key, k1, k2 = jax.random.split(key, 3)
        w1, b1 = init_linear(k1, ci, ch)
        w2, b2 = init_linear(k2, ch, co)
        w1s.append(_pad2d(w1, c_act, c_mid).astype(jnp.bfloat16))
        b1s.append(_pad2d(b1, 1, c_mid))
        w2s.append(_pad2d(w2, c_mid, c_act).astype(jnp.bfloat16))
        b2s.append(_pad2d(b2, 1, c_act))

    key, k1, k2 = jax.random.split(key, 3)
    wf1, bf1 = init_linear(k1, out_channels, out_channels)
    wf2, bf2 = init_linear(k2, out_channels, 1)

    return dict(
        eps=jnp.zeros((len(dims),), jnp.float32),        # GINConv(eps=0, train_eps)
        w1=jnp.stack(w1s), b1=jnp.stack(b1s),
        w2=jnp.stack(w2s), b2=jnp.stack(b2s),
        wf1=_pad2d(wf1, c_act, c_act).astype(jnp.bfloat16), bf1=_pad2d(bf1, 1, c_act),
        wf2=_pad2d(wf2, c_act, LANE).astype(jnp.bfloat16), bf2=_pad2d(bf2, 1, LANE),
        c_act=c_act, c_mid=c_mid,
        in_channels=in_channels, out_channels=out_channels,
    )


def gin_forward(x, edge_index, batch, num_graphs, params,
                *, block_m=512, block_k=1024, fuse_layers=None):
    n, c_in = x.shape
    c_act = params["c_act"]
    L = int(params["w1"].shape[0])

    n_pad = _round_up(max(n, 1), LANE)
    g_pad = _round_up(max(num_graphs, 1), 8)

    # Fused resident-A path when the bf16 adjacency (double-buffered) + pool
    # matrix comfortably fit the 40 MiB scoped VMEM on every generation
    # (incl. v7x's 64 MiB physical); otherwise tile over dst x src.
    if fuse_layers is None:
        fuse_layers = (n_pad <= 2048 and g_pad <= 512)

    tm = tk = None
    if not fuse_layers:
        tm = min(block_m, n_pad)
        tk = min(block_k, n_pad)
        n_pad = _round_up(n_pad, (tm * tk) // math.gcd(tm, tk))
        # v7x megacore: keep >= 2 dst tiles so both TensorCores get work.
        if n_pad // tm < 2 and tm % 2 == 0 and tm // 2 >= LANE:
            tm //= 2

    # Dense adjacency A[dst, src] built directly in bf16 (edge multiplicities
    # are small integers; exact up to 256 parallel edges per pair).
    src, dst = edge_index[0], edge_index[1]
    adj = jnp.zeros((n_pad, n_pad), jnp.bfloat16).at[dst, src].add(1.0)

    # One-hot pooling matrix P[g, node] (bf16, exact); padded nodes -> no graph.
    batch_pad = jnp.full((n_pad,), -1, jnp.int32).at[:n].set(batch.astype(jnp.int32))
    pool_mat = (batch_pad[None, :] ==
                jnp.arange(g_pad, dtype=jnp.int32)[:, None]).astype(jnp.bfloat16)

    # Node features padded to 128 lanes, bf16 (single stream, no f32 copy).
    h0 = jnp.zeros((n_pad, c_act), jnp.bfloat16).at[:n, :c_in].set(
        x.astype(jnp.bfloat16))

    if fuse_layers:
        out = gin_fused(h0, adj, pool_mat, params)
    else:
        h = h0
        for l in range(L):
            h = gin_conv(h, adj, params["eps"][l:l + 1],
                         params["w1"][l], params["b1"][l],
                         params["w2"][l], params["b2"][l], tm=tm, tk=tk)
        out = pool_and_final_mlp(pool_mat, h, params["wf1"], params["bf1"],
                                 params["wf2"], params["bf2"], tk=tk)
    return out[:num_graphs, :1]


# ------------------------------ Pure-JAX reference ---------------------------

def gin_reference(x, edge_index, batch, num_graphs, params):
    n, c_in = x.shape
    c_act = params["c_act"]
    src, dst = edge_index[0], edge_index[1]
    adj = jnp.zeros((n, n), jnp.float32).at[dst, src].add(1.0)
    h = jnp.zeros((n, c_act), jnp.float32).at[:, :c_in].set(x.astype(jnp.float32))
    L = int(params["w1"].shape[0])
    for l in range(L):
        z = (1.0 + params["eps"][l]) * h + adj @ h
        h = jnp.maximum(z @ params["w1"][l].astype(jnp.float32) + params["b1"][l], 0.0)
        h = jnp.maximum(h @ params["w2"][l].astype(jnp.float32) + params["b2"][l], 0.0)
    pool = (batch[None, :] ==
            jnp.arange(num_graphs, dtype=jnp.int32)[:, None]).astype(jnp.float32)
    pooled = pool @ h
    hid = jnp.maximum(pooled @ params["wf1"].astype(jnp.float32) + params["bf1"], 0.0)
    return (hid @ params["wf2"].astype(jnp.float32) + params["bf2"])[:, :1]


# ---------------------------------- Demo ------------------------------------

if __name__ == "__main__":
    in_channels = 4
    hidden_channels = 32
    num_layers = 3
    out_channels = 8

    nodes_per_graph = 8
    num_graphs = 2
    n = nodes_per_graph * num_graphs

    key = jax.random.PRNGKey(0)
    key, kx, kp = jax.random.split(key, 3)

    # Node features [N, in_channels].
    x = jax.random.normal(kx, (n, in_channels), jnp.float32)

    # Two ring graphs (bidirectional edges), edge_index [2, E].
    srcs, dsts = [], []
    for g in range(num_graphs):
        off = g * nodes_per_graph
        for i in range(nodes_per_graph):
            j = (i + 1) % nodes_per_graph
            srcs += [off + i, off + j]
            dsts += [off + j, off + i]
    edge_index = jnp.array([srcs, dsts], dtype=jnp.int32)

    # Graph assignment vector [N].
    batch = jnp.repeat(jnp.arange(num_graphs, dtype=jnp.int32), nodes_per_graph)

    params = init_gin_params(kp, in_channels, hidden_channels, num_layers,
                             out_channels)

    ref = gin_reference(x, edge_index, batch, num_graphs, params)
    scale = float(jnp.max(jnp.abs(ref))) + 1.0

    # Fused resident-A path (default for small/medium graphs).
    count = gin_forward(x, edge_index, batch, num_graphs, params,
                        fuse_layers=True)
    count = jax.block_until_ready(count)
    assert count.shape == (num_graphs, 1)
    err = float(jnp.max(jnp.abs(count - ref)))
    assert err <= 5e-2 * scale, f"fused mismatch: max|err|={err} vs scale={scale}"

    # Tiled per-layer fallback path (large-graph code path).
    count_t = gin_forward(x, edge_index, batch, num_graphs, params,
                          fuse_layers=False)
    count_t = jax.block_until_ready(count_t)
    assert count_t.shape == (num_graphs, 1)
    err_t = float(jnp.max(jnp.abs(count_t - ref)))
    assert err_t <= 5e-2 * scale, f"tiled mismatch: max|err|={err_t} vs scale={scale}"

    print("KERNEL_OK")
</pallas_src>

<mosaic_0001>
module attributes {stable_mosaic.version = 11 : i64} {
  func.func @_gin_fused_kernel(%arg0: i32, %arg1: memref<3xf32, #tpu.memory_space<smem>>, %arg2: memref<128x128xbf16, #tpu.memory_space<vmem>>, %arg3: memref<128x128xbf16, #tpu.memory_space<vmem>>, %arg4: memref<8x128xbf16, #tpu.memory_space<vmem>>, %arg5: memref<1x128x128xbf16, #tpu.memory_space<vmem>>, %arg6: memref<1x1x128xf32, #tpu.memory_space<vmem>>, %arg7: memref<1x128x128xbf16, #tpu.memory_space<vmem>>, %arg8: memref<1x1x128xf32, #tpu.memory_space<vmem>>, %arg9: memref<128x128xbf16, #tpu.memory_space<vmem>>, %arg10: memref<1x128xf32, #tpu.memory_space<vmem>>, %arg11: memref<128x128xbf16, #tpu.memory_space<vmem>>, %arg12: memref<1x128xf32, #tpu.memory_space<vmem>>, %arg13: memref<8x128xf32, #tpu.memory_space<vmem>>, %arg14: memref<128x128xbf16, #tpu.memory_space<vmem>>) attributes {dimension_semantics = [#tpu.dimension_semantics<arbitrary>], iteration_bounds = array<i64: 3>, scalar_prefetch = 0 : i64, scratch_operands = 1 : i64, tpu.core_type = #tpu.core_type<tc>, window_params = [{transform_indices = @transform_0, window_bounds = array<i64: 3>}, {pipeline_mode = #tpu.pipeline_mode<synchronous>, transform_indices = @transform_1, window_bounds = array<i64: 128, 128>}, {pipeline_mode = #tpu.pipeline_mode<synchronous>, transform_indices = @transform_2, window_bounds = array<i64: 128, 128>}, {pipeline_mode = #tpu.pipeline_mode<synchronous>, transform_indices = @transform_3, window_bounds = array<i64: 8, 128>}, {transform_indices = @transform_4, window_bounds = array<i64: 1, 128, 128>}, {transform_indices = @transform_5, window_bounds = array<i64: 1, 1, 128>}, {transform_indices = @transform_6, window_bounds = array<i64: 1, 128, 128>}, {transform_indices = @transform_7, window_bounds = array<i64: 1, 1, 128>}, {pipeline_mode = #tpu.pipeline_mode<synchronous>, transform_indices = @transform_8, window_bounds = array<i64: 128, 128>}, {pipeline_mode = #tpu.pipeline_mode<synchronous>, transform_indices = @transform_9, window_bounds = array<i64: 1, 128>}, {pipeline_mode = #tpu.pipeline_mode<synchronous>, transform_indices = @transform_10, window_bounds = array<i64: 128, 128>}, {pipeline_mode = #tpu.pipeline_mode<synchronous>, transform_indices = @transform_11, window_bounds = array<i64: 1, 128>}, {pipeline_mode = #tpu.pipeline_mode<synchronous>, transform_indices = @transform_12, window_bounds = array<i64: 8, 128>}]} {
    %c0_i32 = arith.constant 0 : i32
    %0 = arith.cmpi eq, %arg0, %c0_i32 : i32
    %1 = arith.extui %0 : i1 to i32
    %c0_i32_0 = arith.constant 0 : i32
    %2 = arith.cmpi ne, %1, %c0_i32_0 : i32
    scf.if %2 {
      %c0_24 = arith.constant 0 : index
      %c0_25 = arith.constant 0 : index
      %38 = vector.load %arg2[%c0_24, %c0_25] : memref<128x128xbf16, #tpu.memory_space<vmem>>, vector<128x128xbf16>
      %c0_26 = arith.constant 0 : index
      %c0_27 = arith.constant 0 : index
      %39 = vector.load %arg14[%c0_26, %c0_27] : memref<128x128xbf16, #tpu.memory_space<vmem>>, vector<128x128xbf16>
      tpu.vector_store %arg14[%c0_26, %c0_27], %38 {strides = array<i32>} : memref<128x128xbf16, #tpu.memory_space<vmem>>, vector<128x128xbf16>,
    } else {
    }
    %c0 = arith.constant 0 : index
    %c0_1 = arith.constant 0 : index
    %3 = vector.load %arg14[%c0, %c0_1] : memref<128x128xbf16, #tpu.memory_space<vmem>>, vector<128x128xbf16>
    %4 = arith.index_cast %arg0 : i32 to index
    %5 = memref.load %arg1[%4] : memref<3xf32, #tpu.memory_space<smem>>
    %cst = arith.constant 1.000000e+00 : f32
    %6 = arith.addf %cst, %5 : f32
    %7 = arith.extf %3 : vector<128x128xbf16> to vector<128x128xf32>
    %8 = vector.broadcast %6 : f32 to vector<128x128xf32>
    %9 = arith.mulf %8, %7 : vector<128x128xf32>
    %c0_2 = arith.constant 0 : index
    %c0_3 = arith.constant 0 : index
    %10 = vector.load %arg3[%c0_2, %c0_3] : memref<128x128xbf16, #tpu.memory_space<vmem>>, vector<128x128xbf16>
    %cst_4 = arith.constant dense<0.000000e+00> : vector<128x128xf32>
    %11 = tpu.matmul %10, %3, %cst_4 {dimension_numbers = #tpu.dot_dimension_numbers<[1], [0], [0], [1], [0, 0, 1, 1], [], []>} : vector<128x128xbf16>, vector<128x128xbf16>, vector<128x128xf32> -> vector<128x128xf32>
    %12 = arith.addf %9, %11 : vector<128x128xf32>
    %13 = arith.truncf %12 : vector<128x128xf32> to vector<128x128xbf16>
    %c0_5 = arith.constant 0 : index
    %c0_6 = arith.constant 0 : index
    %c0_7 = arith.constant 0 : index
    %14 = vector.load %arg5[%c0_5, %c0_6, %c0_7] : memref<1x128x128xbf16, #tpu.memory_space<vmem>>, vector<1x128x128xbf16>
    %15 = vector.shape_cast %14 : vector<1x128x128xbf16> to vector<128x128xbf16>
    %cst_8 = arith.constant dense<0.000000e+00> : vector<128x128xf32>
    %16 = tpu.matmul %13, %15, %cst_8 {dimension_numbers = #tpu.dot_dimension_numbers<[1], [0], [0], [1], [0, 0, 1, 1], [], []>} : vector<128x128xbf16>, vector<128x128xbf16>, vector<128x128xf32> -> vector<128x128xf32>
    %c0_9 = arith.constant 0 : index
    %c0_10 = arith.constant 0 : index
    %c0_11 = arith.constant 0 : index
    %17 = vector.load %arg6[%c0_9, %c0_10, %c0_11] : memref<1x1x128xf32, #tpu.memory_space<vmem>>, vector<1x1x128xf32>
    %18 = vector.shape_cast %17 : vector<1x1x128xf32> to vector<1x128xf32>
    %19 = vector.broadcast %18 : vector<1x128xf32> to vector<128x128xf32>
    %20 = arith.addf %16, %19 : vector<128x128xf32>
    %cst_12 = arith.constant 0.000000e+00 : f32
    %21 = vector.broadcast %cst_12 : f32 to vector<128x128xf32>
    %22 = arith.maximumf %20, %21 : vector<128x128xf32>
    %23 = arith.truncf %22 : vector<128x128xf32> to vector<128x128xbf16>
    %c0_13 = arith.constant 0 : index
    %c0_14 = arith.constant 0 : index
    %c0_15 = arith.constant 0 : index
    %24 = vector.load %arg7[%c0_13, %c0_14, %c0_15] : memref<1x128x128xbf16, #tpu.memory_space<vmem>>, vector<1x128x128xbf16>
    %25 = vector.shape_cast %24 : vector<1x128x128xbf16> to vector<128x128xbf16>
    %cst_16 = arith.constant dense<0.000000e+00> : vector<128x128xf32>
    %26 = tpu.matmul %23, %25, %cst_16 {dimension_numbers = #tpu.dot_dimension_numbers<[1], [0], [0], [1], [0, 0, 1, 1], [], []>} : vector<128x128xbf16>, vector<128x128xbf16>, vector<128x128xf32> -> vector<128x128xf32>
    %c0_17 = arith.constant 0 : index
    %c0_18 = arith.constant 0 : index
    %c0_19 = arith.constant 0 : index
    %27 = vector.load %arg8[%c0_17, %c0_18, %c0_19] : memref<1x1x128xf32, #tpu.memory_space<vmem>>, vector<1x1x128xf32>
    %28 = vector.shape_cast %27 : vector<1x1x128xf32> to vector<1x128xf32>
    %29 = vector.broadcast %28 : vector<1x128xf32> to vector<128x128xf32>
    %30 = arith.addf %26, %29 : vector<128x128xf32>
    %cst_20 = arith.constant 0.000000e+00 : f32
    %31 = vector.broadcast %cst_20 : f32 to vector<128x128xf32>
    %32 = arith.maximumf %30, %31 : vector<128x128xf32>
    %33 = arith.truncf %32 : vector<128x128xf32> to vector<128x128xbf16>
    %c0_21 = arith.constant 0 : index
    %c0_22 = arith.constant 0 : index
    %34 = vector.load %arg14[%c0_21, %c0_22] : memref<128x128xbf16, #tpu.memory_space<vmem>>, vector<128x128xbf16>
    tpu.vector_store %arg14[%c0_21, %c0_22], %33 {strides = array<i32>} : memref<128x128xbf16, #tpu.memory_space<vmem>>, vector<128x128xbf16>,
    %c2_i32 = arith.constant 2 : i32
    %35 = arith.cmpi eq, %arg0, %c2_i32 : i32
    %36 = arith.extui %35 : i1 to i32
    %c0_i32_23 = arith.constant 0 : i32
    %37 = arith.cmpi ne, %36, %c0_i32_23 : i32
    scf.if %37 {
      %c0_24 = arith.constant 0 : index
      %c0_25 = arith.constant 0 : index
      %38 = vector.load %arg4[%c0_24, %c0_25] : memref<8x128xbf16, #tpu.memory_space<vmem>>, vector<8x128xbf16>
      %c0_26 = arith.constant 0 : index
      %c0_27 = arith.constant 0 : index
      %39 = vector.load %arg14[%c0_26, %c0_27] : memref<128x128xbf16, #tpu.memory_space<vmem>>, vector<128x128xbf16>
      %cst_28 = arith.constant dense<0.000000e+00> : vector<8x128xf32>
      %40 = tpu.matmul %38, %39, %cst_28 {dimension_numbers = #tpu.dot_dimension_numbers<[1], [0], [0], [1], [0, 0, 1, 1], [], []>} : vector<8x128xbf16>, vector<128x128xbf16>, vector<8x128xf32> -> vector<8x128xf32>
      %41 = arith.truncf %40 : vector<8x128xf32> to vector<8x128xbf16>
      %c0_29 = arith.constant 0 : index
      %c0_30 = arith.constant 0 : index
      %42 = vector.load %arg9[%c0_29, %c0_30] : memref<128x128xbf16, #tpu.memory_space<vmem>>, vector<128x128xbf16>
      %cst_31 = arith.constant dense<0.000000e+00> : vector<8x128xf32>
      %43 = tpu.matmul %41, %42, %cst_31 {dimension_numbers = #tpu.dot_dimension_numbers<[1], [0], [0], [1], [0, 0, 1, 1], [], []>} : vector<8x128xbf16>, vector<128x128xbf16>, vector<8x128xf32> -> vector<8x128xf32>
      %c0_32 = arith.constant 0 : index
      %c0_33 = arith.constant 0 : index
      %44 = vector.load %arg10[%c0_32, %c0_33] : memref<1x128xf32, #tpu.memory_space<vmem>>, vector<1x128xf32>
      %45 = vector.broadcast %44 : vector<1x128xf32> to vector<8x128xf32>
      %46 = arith.addf %43, %45 : vector<8x128xf32>
      %cst_34 = arith.constant 0.000000e+00 : f32
      %47 = vector.broadcast %cst_34 : f32 to vector<8x128xf32>
      %48 = arith.maximumf %46, %47 : vector<8x128xf32>
      %49 = arith.truncf %48 : vector<8x128xf32> to vector<8x128xbf16>
      %c0_35 = arith.constant 0 : index
      %c0_36 = arith.constant 0 : index
      %50 = vector.load %arg11[%c0_35, %c0_36] : memref<128x128xbf16, #tpu.memory_space<vmem>>, vector<128x128xbf16>
      %cst_37 = arith.constant dense<0.000000e+00> : vector<8x128xf32>
      %51 = tpu.matmul %49, %50, %cst_37 {dimension_numbers = #tpu.dot_dimension_numbers<[1], [0], [0], [1], [0, 0, 1, 1], [], []>} : vector<8x128xbf16>, vector<128x128xbf16>, vector<8x128xf32> -> vector<8x128xf32>
      %c0_38 = arith.constant 0 : index
      %c0_39 = arith.constant 0 : index
      %52 = vector.load %arg12[%c0_38, %c0_39] : memref<1x128xf32, #tpu.memory_space<vmem>>, vector<1x128xf32>
      %53 = vector.broadcast %52 : vector<1x128xf32> to vector<8x128xf32>
      %54 = arith.addf %51, %53 : vector<8x128xf32>
      %c0_40 = arith.constant 0 : index
      %c0_41 = arith.constant 0 : index
      %55 = vector.load %arg13[%c0_40, %c0_41] : memref<8x128xf32, #tpu.memory_space<vmem>>, vector<8x128xf32>
      tpu.vector_store %arg13[%c0_40, %c0_41], %54 {strides = array<i32>} : memref<8x128xf32, #tpu.memory_space<vmem>>, vector<8x128xf32>,
    } else {
    }
    return
  }
  func.func @transform_0(%arg0: i32) -> i32 {
    %c0_i32 = arith.constant 0 : i32
    %c0_i32_0 = arith.constant 0 : i32
    return %c0_i32 : i32
  }
  func.func @transform_1(%arg0: i32) -> (i32, i32) {
    %c0_i32 = arith.constant 0 : i32
    %c0_i32_0 = arith.constant 0 : i32
    %c0_i32_1 = arith.constant 0 : i32
    return %c0_i32, %c0_i32_0 : i32, i32
  }
  func.func @transform_2(%arg0: i32) -> (i32, i32) {
    %c0_i32 = arith.constant 0 : i32
    %c0_i32_0 = arith.constant 0 : i32
    %c0_i32_1 = arith.constant 0 : i32
    return %c0_i32, %c0_i32_0 : i32, i32
  }
  func.func @transform_3(%arg0: i32) -> (i32, i32) {
    %c0_i32 = arith.constant 0 : i32
    %c0_i32_0 = arith.constant 0 : i32
    %c0_i32_1 = arith.constant 0 : i32
    return %c0_i32, %c0_i32_0 : i32, i32
  }
  func.func @transform_4(%arg0: i32) -> (i32, i32, i32) {
    %c0_i32 = arith.constant 0 : i32
    %c0_i32_0 = arith.constant 0 : i32
    %c0_i32_1 = arith.constant 0 : i32
    return %arg0, %c0_i32, %c0_i32_0 : i32, i32, i32
  }
  func.func @transform_5(%arg0: i32) -> (i32, i32, i32) {
    %c0_i32 = arith.constant 0 : i32
    %c0_i32_0 = arith.constant 0 : i32
    %c0_i32_1 = arith.constant 0 : i32
    return %arg0, %c0_i32, %c0_i32_0 : i32, i32, i32
  }
  func.func @transform_6(%arg0: i32) -> (i32, i32, i32) {
    %c0_i32 = arith.constant 0 : i32
    %c0_i32_0 = arith.constant 0 : i32
    %c0_i32_1 = arith.constant 0 : i32
    return %arg0, %c0_i32, %c0_i32_0 : i32, i32, i32
  }
  func.func @transform_7(%arg0: i32) -> (i32, i32, i32) {
    %c0_i32 = arith.constant 0 : i32
    %c0_i32_0 = arith.constant 0 : i32
    %c0_i32_1 = arith.constant 0 : i32
    return %arg0, %c0_i32, %c0_i32_0 : i32, i32, i32
  }
  func.func @transform_8(%arg0: i32) -> (i32, i32) {
    %c0_i32 = arith.constant 0 : i32
    %c0_i32_0 = arith.constant 0 : i32
    %c0_i32_1 = arith.constant 0 : i32
    return %c0_i32, %c0_i32_0 : i32, i32
  }
  func.func @transform_9(%arg0: i32) -> (i32, i32) {
    %c0_i32 = arith.constant 0 : i32
    %c0_i32_0 = arith.constant 0 : i32
    %c0_i32_1 = arith.constant 0 : i32
    return %c0_i32, %c0_i32_0 : i32, i32
  }
  func.func @transform_10(%arg0: i32) -> (i32, i32) {
    %c0_i32 = arith.constant 0 : i32
    %c0_i32_0 = arith.constant 0 : i32
    %c0_i32_1 = arith.constant 0 : i32
    return %c0_i32, %c0_i32_0 : i32, i32
  }
  func.func @transform_11(%arg0: i32) -> (i32, i32) {
    %c0_i32 = arith.constant 0 : i32
    %c0_i32_0 = arith.constant 0 : i32
    %c0_i32_1 = arith.constant 0 : i32
    return %c0_i32, %c0_i32_0 : i32, i32
  }
  func.func @transform_12(%arg0: i32) -> (i32, i32) {
    %c0_i32 = arith.constant 0 : i32
    %c0_i32_0 = arith.constant 0 : i32
    %c0_i32_1 = arith.constant 0 : i32
    return %c0_i32, %c0_i32_0 : i32, i32
  }
}

</mosaic_0001>

<bundles_post_ra>
// kernel: tpu_custom_call.1
= control target key start
LH: loop header
LB: loop body
LE: loop exit
PB: predicated region body
PF: predicated region fallthrough
CT: control target
= control target key end

     0   :  { %s2723_s0 = inlined_call_operand.hbm [shape: f32[3], index: 0, kind: input, shape index: {}]   ;;  %s2724_s1 = inlined_call_operand.hbm [shape: bf16[128,128], index: 1, kind: input, shape index: {}]   ;;  %s2725_s2 = inlined_call_operand.hbm [shape: bf16[128,128], index: 2, kind: input, shape index: {}]   ;;  %s2726_s3 = inlined_call_operand.hbm [shape: bf16[8,128], index: 3, kind: input, shape index: {}]   ;;  %s2727_s4 = inlined_call_operand.hbm [shape: bf16[3,128,128], index: 4, kind: input, shape index: {}]   ;;  %s2728_s5 = inlined_call_operand.vmem [shape: f32[3,1,128], index: 5, kind: input, shape index: {}]   ;;  %s2729_s6 = inlined_call_operand.hbm [shape: bf16[3,128,128], index: 6, kind: input, shape index: {}]   ;;  %s2730_s7 = inlined_call_operand.vmem [shape: f32[3,1,128], index: 7, kind: input, shape index: {}]   ;;  %s2731_s8 = inlined_call_operand.hbm [shape: bf16[128,128], index: 8, kind: input, shape index: {}]   ;;  %s2732_s9 = inlined_call_operand.vmem [shape: f32[1,128], index: 9, kind: input, shape index: {}]   ;;  %s2733_s10 = inlined_call_operand.hbm [shape: bf16[128,128], index: 10, kind: input, shape index: {}]   ;;  %s2734_s11 = inlined_call_operand.vmem [shape: f32[1,128], index: 11, kind: input, shape index: {}]   ;;  %s2735_s12 = inlined_call_operand.hbm [shape: f32[8,128], index: 12, kind: output, shape index: {}]  }
   0x1   :  { %2743 = sst [smem:[#allocation27_spill]] %s2723_s0 }
   0x2   :  { %2744 = sst [smem:[#allocation28_spill]] %s2725_s2 }
   0x3   :  { %2745 = sst [smem:[#allocation29_spill]] %s2727_s4 }
   0x4   :  { %2746 = sst [smem:[#allocation30_spill]] %s2731_s8 }
   0x5   :  { %2747 = sst [smem:[#allocation31_spill]] %s2735_s12 }
   0x6   :  { %17 = vsyncpa [#allocation6], 0 }
   0x7   :  { %18 = vsyncpa [#allocation4], 0 }
   0x8   :  { %19 = vsyncpa [#allocation9], 0 }
   0x9   :  { %20 = vsyncpa [#allocation12], 0 }
   0xa   :  { %22 = vsyncpa [#allocation12 + $0x1], 0 }
   0xb   :  { %23 = vsyncpa [#allocation15], 0 }
   0xc   :  { %24 = vsyncpa [#allocation5], 0  ;;  %s2453_s21 = smov 0   ;;  %s2455_s22 = smov 0  }
   0xd   :  { %s2457_s23 = smov 0   ;;  %s2459_s24 = smov 0  }
   0xe LB: > { %2748 = sst [smem:[#allocation24_spill]] %s2373_s23  ;;  %s2474_s25 = sadd.s32 4294967295, %s2377_s24   ;;  %s2377_s24 = sphi %s2459_s24, %s2762_s24   ;;  %s2373_s23 = sphi %s2457_s23, %s2764_s23   ;;  %s2369_s22 = sphi %s2455_s22, %s2766_s22   ;;  %s2365_s21 = sphi %s2453_s21, %s2765_s21  }
   0xf   : > { %p1570_p0 = scmp.ge.s32.totalorder %s2377_s24, 1  ;;  %p135_p1 = scmp.eq.s32.totalorder %s2474_s25, 0 }
  0x10   : > { %p328_p2 = scmp.lt.s32.totalorder %s2377_s24, 4  ;;  %p1571_p3 = scmp.ne.s32.totalorder %s2474_s25, 0 }
  0x11   : > { %s2749_s2 = sld [smem:[#allocation28_spill]]  ;;  %s2379_s30 = smov [#allocation8]  }
  0x12   : > { %p2483_p4 = pnand %p1570_p0, %p328_p2  ;;  %s365_s13 = sshll.u32 %s2379_s30, 4  ;;  %s366_s13 = int_to_ptr.vmem [resolvable:$true] %s365_s13 }
  0x13   : > { %s2751_s8 = sld [smem:[#allocation30_spill]]  ;;  %s2380_s18 = smov [#allocation14]  }
  0x14   : > { %p1984_p5 = pneg %p2483_p4  ;;  %s391_s19 = sshll.u32 %s2380_s18, 4  ;;  %s392_s19 = int_to_ptr.vmem [resolvable:$true] %s391_s19 }
  0x15   : > { %s2736_s20 = smov 64   ;;  %s2738_s26 = smov 4  }
  0x16   : > { %p2494_p6 = pnand %p1984_p5, %p135_p1  ;;  %s2509_s27 = sadd.s32 1, %s2377_s24  }
  0x17   : > { %s363_s28 = sshll.u32 %s2749_s2, 4  ;;  %2753 = sst [smem:[#allocation25_spill]] %s2509_s27  ;;  %s364_s28 = int_to_ptr.hbm [resolvable:$true] %s363_s28 }
  0x18   : > { %1993 = dma.hbm_to_vmem [thread:$0]  (!%p2494_p6), %s364_s28, 1024, %s366_s13, [#allocation9], %s2736_s20, %s2736_s20, %s2738_s26  }
  0x19   : > { %s389_s16 = sshll.u32 %s2751_s8, 4  ;;  %s121_s30 = sadd.s32 1, %s2373_s23  ;;  %s390_s16 = int_to_ptr.hbm [resolvable:$true] %s389_s16 }
  0x1a   : > { %1999 = dma.hbm_to_vmem [thread:$0]  (!%p2494_p6), %s390_s16, 1024, %s392_s19, [#allocation15], %s2736_s20, %s2736_s20, %s2738_s26  }
  0x1b   : > { %s118_s14 = ssub.s32 %s2377_s24, %s2509_s27  ;;  %p128_p7 = scmp.ne.s32.totalorder %s2373_s23, %s2369_s22 }
  0x1c   : > { %p119_p8 = scmp.eq.s32.totalorder %s118_s14, 0  ;;  %p129_p9 = scmp.eq.s32.totalorder %s2377_s24, 0 }
  0x1d   : > { %p134_p10 = scmp.ne.s32.totalorder %s2369_s22, %s2365_s21  ;;  %p2016_p11 = scmp.lt.s32.totalorder %s2377_s24, 3 }
  0x1e   : > { %s2521_s15 = scalar_select %p119_p8, %s2373_s23, %s121_s30  }
  0x1f   : > { %p130_p12 = por %p129_p9, %p128_p7  ;;  %p2525_p13 = por %p135_p1, %p134_p10 }
  0x20   : > { %2754 = sst [smem:[#allocation26_spill]] %s2521_s15  ;;  %s425_s13 = sand.u32 1, %s2377_s24  }
  0x21   : > { %s427_s16 = sand.u32 1, %s2373_s23   ;;  %s1823_s19 = sshll.u32 %s2377_s24, 6 }
  0x22   : > { %s2531_s18 = sshll.u32 %s427_s16, 6  ;;  %s2756_s4 = sld [smem:[#allocation29_spill]] }
  0x23   : > { %s429_s21 = scalar_lea.vmem [#allocation11], %s2531_s18  ;;  %p2540_p0 = pnand %p2016_p11, %p130_p12 }
  0x24   : > { %s437_s2 = sshll.u32 %s429_s21, 4  ;;  %s462_s16 = scalar_lea.hbm %s2729_s6, %s1823_s19  ;;  %s438_s2 = int_to_ptr.vmem [resolvable:$true] %s437_s2 }
  0x25   : > { %s463_s27 = sshll.u32 %s462_s16, 4  ;;  %s2547_s12 = scalar_lea.sflag [#allocation12], %s425_s13  ;;  %s2566_s27 = int_to_ptr.hbm [resolvable:$true] %s463_s27 }
  0x26   : > { %p2134_p5 = pneg %p2540_p0 }
  0x28   : > { %s434_s26 = scalar_lea.hbm %s2756_s4, %s1823_s19  ;;  %s2137_s23 = scalar_lea.hbm %s2756_s4, 192 }
  0x29   : > { %s435_s30 = sshll.u32 %s434_s26, 4  ;;  %s436_s30 = int_to_ptr.hbm [resolvable:$true] %s435_s30 }
  0x2a   : > { %s2130_s20 = sshra.s32 %s436_s30, 4  ;;  %s2131_s20 = int_to_ptr.hbm [resolvable:$true] %s2130_s20 }
  0x2b   : > { %s2132_s14 = scalar_lea.hbm %s2131_s20, 64  ;;  %p2138_p9 = scmp.lt.s32.totalorder %s2131_s20, %s2756_s4 }
  0x2c   : > { %p2133_p2 = scmp.ne.s32.totalorder %s2131_s20, %s2132_s14  ;;  %p2139_p10 = scmp.lt.s32.totalorder %s2137_s23, %s2132_s14 }
  0x2e   : > { %p2135_p7 = pnand %p2134_p5, %p2133_p2  ;;  %p2140_p11 = por %p2139_p10, %p2138_p9 }
  0x30   : > { %p2136_p8 = pneg %p2135_p7 }
  0x32   : > { %p2141_p12 = pnand %p2140_p11, %p2136_p8 }
  0x34   : > { %2144 = shalt.err (!%p2141_p12)
}
  0x35   : > { %s2758_s13 = smov 4   ;;  %s2759_s19 = smov 64  }
  0x36   : > { %2006 = dma.hbm_to_vmem [thread:$0]  (!%p2540_p0), %s436_s30, 1024, %s438_s2, %s2547_s12, %s2759_s19, %s2759_s19, %s2758_s13  }
  0x37   : > { %s2760_s0 = sld [smem:[#allocation27_spill]]  ;;  %s2383_s14 = smov [#allocation3]  }
  0x38   : > { %s349_s15 = sshll.u32 %s2724_s1, 4  ;;  %s2384_s21 = smov [#allocation7]   ;;  %s350_s15 = int_to_ptr.hbm [resolvable:$true] %s349_s15 }
  0x39   : > { %s351_s4 = sshll.u32 %s2384_s21, 4  ;;  %s378_s16 = sshll.u32 %s2726_s3, 4  ;;  %s352_s4 = int_to_ptr.vmem [resolvable:$true] %s351_s4  ;;  %s379_s16 = int_to_ptr.hbm [resolvable:$true] %s378_s16 }
  0x3a   : > { %1990 = dma.hbm_to_vmem [thread:$0]  (!%p2494_p6), %s350_s15, 1024, %s352_s4, [#allocation4], %s2759_s19, %s2759_s19, %s2758_s13  }
  0x3b   : > { %s2385_s24 = smov [#allocation10]   ;;  %s406_s23 = sshll.u32 %s2733_s10, 4  ;;  %s407_s23 = int_to_ptr.hbm [resolvable:$true] %s406_s23 }
  0x3c   : > { %s457_s21 = scalar_lea.vmem [#allocation13], %s2531_s18  ;;  %s2386_s2 = smov [#allocation16]  }
  0x3d   : > { %s340_s20 = sshll.u32 %s2760_s0, 4  ;;  %s465_s0 = sshll.u32 %s457_s21, 4  ;;  %s341_s20 = int_to_ptr.hbm [resolvable:$true] %s340_s20  ;;  %s466_s0 = int_to_ptr.vmem [resolvable:$true] %s465_s0 }
  0x3e   : > { %1987 = dma.hbm_to_smem (!%p2494_p6), %s341_s20, 16, %s2383_s14, [#allocation6]  }
  0x3f   : > { %s380_s20 = sshll.u32 %s2385_s24, 4  ;;  %s408_s30 = sshll.u32 %s2386_s2, 4  ;;  %s381_s20 = int_to_ptr.vmem [resolvable:$true] %s380_s20  ;;  %s409_s30 = int_to_ptr.vmem [resolvable:$true] %s408_s30 }
  0x40   : > { %1996 = dma.hbm_to_vmem [thread:$0]  (!%p2494_p6), %s379_s16, 64, %s381_s20, [#allocation9]  }
  0x41   : > { %2002 = dma.hbm_to_vmem [thread:$0]  (!%p2494_p6), %s407_s23, 1024, %s409_s30, [#allocation15], %s2759_s19, %s2759_s19, %s2758_s13  }
  0x42   : > { %s2265_s4 = sshra.s32 %s2566_s27, 4  ;;  %s2272_s24 = scalar_lea.hbm %s2729_s6, 192  ;;  %s2266_s4 = int_to_ptr.hbm [resolvable:$true] %s2265_s4 }
  0x43   : > { %s2267_s15 = scalar_lea.hbm %s2266_s4, 64  ;;  %p2273_p9 = scmp.lt.s32.totalorder %s2266_s4, %s2729_s6 }
  0x44   : > { %p2268_p2 = scmp.ne.s32.totalorder %s2266_s4, %s2267_s15  ;;  %p2274_p10 = scmp.lt.s32.totalorder %s2272_s24, %s2267_s15 }
  0x46   : > { %p2270_p7 = pnand %p2268_p2, %p2134_p5  ;;  %p2275_p11 = por %p2274_p10, %p2273_p9 }
  0x48   : > { %p2271_p8 = pneg %p2270_p7 }
  0x4a   : > { %p2276_p12 = pnand %p2275_p11, %p2271_p8 }
  0x4c   : > { %2279 = shalt.err (!%p2276_p12)
}
  0x4d   : > { %2009 = dma.hbm_to_vmem [thread:$0]  (!%p2540_p0), %s2566_s27, 1024, %s466_s0, %s2547_s12, %s2759_s19, %s2759_s19, %s2758_s13  }
  0x4e   : > { %483 = sbr.rel (%p2483_p4) target bundleno = 1096 (0x448), region = 68 }
  0x53   : > { %2340 = dma.done.wait (%p135_p1), [#allocation6], 16  }
  0x54   : > { %2342 = vsyncadd (%p135_p1), [#allocation6], 4294967280 }
  0x55   : > { %2344 = dma.done.wait (%p135_p1), [#allocation4], 1024  }
  0x56   : > { %2346 = vsyncadd (%p135_p1), [#allocation4], 4294966272 }
  0x57   : > { %2348 = dma.done.wait (%p135_p1), [#allocation9], 1088  }
  0x58   : > { %2350 = vsyncadd (%p135_p1), [#allocation9], 4294966208  ;;  %s505_s0 = sand.u32 1, %s2474_s25   ;;  %s507_s8 = sand.u32 1, %s2369_s22  }
  0x59   : > { %s1589_s12 = sshll.u32 %s507_s8, 6  ;;  %s506_s29 = scalar_lea.sflag [#allocation12], %s505_s0 }
  0x5a   : > { %s2628_s17 = scalar_lea.vmem [#allocation11], %s1589_s12 }
  0x5b   : > { %2352 = dma.done.wait (%p2525_p13), %s506_s29, 2048  }
  0x5c   : > { %2354 = vsyncadd (%p2525_p13), %s506_s29, 4294965248  ;;  %s2634_s27 = scalar_lea.vmem [#allocation13], %s1589_s12 }
  0x5d   : > { %2356 = dma.done.wait (%p135_p1), [#allocation15], 2048  }
  0x5e   : > { %2358 = vsyncadd (%p135_p1), [#allocation15], 4294965248 }
  0x5f   : > { %535 = sfence }
  0x60   : > { %p578_p4 = scmp.lt.s32.totalorder %s2474_s25, 2  ;;  %587 = sbr.rel (%p1571_p3) target bundleno = 110 (0x6e), region = 104 }
  0x62   : > { %s2642_s13 = scalar_select %p578_p4, %s2474_s25, 2 }
  0x64   : > { %s580_s28 = scalar_lea.vmem %s2728_s5, %s2642_s13  ;;  %s583_s2 = scalar_lea.vmem %s2730_s7, %s2642_s13 }
  0x65   : > { %v588_v0 = vld [vmem:[#allocation7] sm:$0xff]   ;;  %v590_v1 = vld [vmem:[#allocation7 + $0x8] sm:$0xff]   ;;  %v592_v2 = vld [vmem:[#allocation7 + $0x10] sm:$0xff]  }
  0x66   : > { %604 = vst [vmem:[#allocation2] sm:$0xff] %v588_v0   ;;  %v594_v3 = vld [vmem:[#allocation7 + $0x18] sm:$0xff]   ;;  %v596_v4 = vld [vmem:[#allocation7 + $0x20] sm:$0xff]   ;;  %v598_v5 = vld [vmem:[#allocation7 + $0x28] sm:$0xff]  }
  0x67   : > { %606 = vst [vmem:[#allocation2 + $0x8] sm:$0xff] %v590_v1   ;;  %v600_v6 = vld [vmem:[#allocation7 + $0x30] sm:$0xff]   ;;  %v602_v7 = vld [vmem:[#allocation7 + $0x38] sm:$0xff]  }
  0x68   : > { %608 = vst [vmem:[#allocation2 + $0x10] sm:$0xff] %v592_v2  }
  0x69   : > { %610 = vst [vmem:[#allocation2 + $0x18] sm:$0xff] %v594_v3  }
  0x6a   : > { %612 = vst [vmem:[#allocation2 + $0x20] sm:$0xff] %v596_v4  }
  0x6b   : > { %614 = vst [vmem:[#allocation2 + $0x28] sm:$0xff] %v598_v5  }
  0x6c   : > { %616 = vst [vmem:[#allocation2 + $0x30] sm:$0xff] %v600_v6  }
  0x6d   : > { %618 = vst [vmem:[#allocation2 + $0x38] sm:$0xff] %v602_v7  }
  0x6e PF: > { %v1826_v14 = vld [vmem:[#allocation2 + $0x8] sm:$0xff]  ;;  %v1825_v15 = vld [vmem:[#allocation2] sm:$0xff]  ;;  %v1839_v17 = vld [vmem:[#allocation8 + $0x30] sm:$0xff]  ;;  %s636_s30 = sld [smem:[#allocation3 + %s2474_s25]]  ;;  %p1722_p1 = scmp.ne.s32.totalorder %s2474_s25, 2 }
  0x6f   : > { %v1827_v13 = vld [vmem:[#allocation2 + $0x10] sm:$0xff]  ;;  %v1833_v16 = vld [vmem:[#allocation8] sm:$0xff]  ;;  %v1834_v18 = vld [vmem:[#allocation8 + $0x8] sm:$0xff] }
  0x70   : > { %v1828_v12 = vld [vmem:[#allocation2 + $0x18] sm:$0xff]  ;;  %v1835_v20 = vld [vmem:[#allocation8 + $0x10] sm:$0xff]  ;;  %v1845_v25 = vld [vmem:[%s2628_s17 + $0x20] sm:$0xff] }
  0x71   : > { %v1829_v11 = vld [vmem:[#allocation2 + $0x20] sm:$0xff]  ;;  %v1840_v19 = vld [vmem:[#allocation8 + $0x38] sm:$0xff]  ;;  %v1846_v24 = vld [vmem:[%s2628_s17 + $0x28] sm:$0xff] }
  0x72   : > { %v1830_v10 = vld [vmem:[#allocation2 + $0x28] sm:$0xff]  ;;  %v1836_v21 = vld [vmem:[#allocation8 + $0x18] sm:$0xff]  ;;  %v1837_v26 = vld [vmem:[#allocation8 + $0x20] sm:$0xff] }
  0x73   : > { %v1831_v9 = vld [vmem:[#allocation2 + $0x30] sm:$0xff]  ;;  %v1848_v22 = vld [vmem:[%s2628_s17 + $0x38] sm:$0xff]  ;;  %v1838_v28 = vld [vmem:[#allocation8 + $0x28] sm:$0xff] }
  0x74   : > { %v1832_v8 = vld [vmem:[#allocation2 + $0x38] sm:$0xff]  ;;  %924 = vmatpush.bf16.msra.mxu1 %v1848_v22  ;;  %v1842_v30 = vld [vmem:[%s2628_s17 + $0x8] sm:$0xff]  ;;  %v1841_v31 = vld [vmem:[%s2628_s17] sm:$0xff]  ;;  %s637_s4 = sadd.f32 1.0, %s636_s30 }
  0x75   : > { %783 = vmatpush.bf16.msra.mxu0 %v1832_v8  ;;  %1928 = vmatpush.bf16.msra.mxu3 %v1832_v8  ;;  %v1847_v23 = vld [vmem:[%s2628_s17 + $0x30] sm:$0xff]  ;;  %v1844_v27 = vld [vmem:[%s2628_s17 + $0x18] sm:$0xff]  ;;  %v622_v50 = vld [vmem:[#allocation2 + $0x8] sm:$0xff]  }
  0x76   : > { %v1843_v29 = vld [vmem:[%s2628_s17 + $0x10] sm:$0xff]  ;;  %v620_v32 = vld [vmem:[#allocation2] sm:$0xff]   ;;  %v2663_v36 = vstv %s637_s4  ;;  %v640_v54 = vunpack.c.l.bf16 %v622_v50  ;;  %v641_v55 = vunpack.c.h.bf16 %v622_v50 }
  0x77   : > { %v638_v34 = vunpack.c.l.bf16 %v620_v32  ;;  %v639_v35 = vunpack.c.h.bf16 %v620_v32  ;;  %v632_v37 = vld [vmem:[#allocation2 + $0x30] sm:$0xff]   ;;  %v634_v57 = vld [vmem:[#allocation2 + $0x38] sm:$0xff]  }
  0x78   : > { %925 = vmatpush.bf16.msra.mxu1 %v1847_v23  ;;  %v650_v40 = vunpack.c.l.bf16 %v632_v37  ;;  %v651_v42 = vunpack.c.h.bf16 %v632_v37  ;;  %v657_v58 = vmul.f32 %v2663_v36, %v640_v54  ;;  %v658_v59 = vmul.f32 %v2663_v36, %v641_v55  ;;  %v624_v6 = vld [vmem:[#allocation2 + $0x10] sm:$0xff]   ;;  %v1852_v54 = vld [vmem:[%s2634_s27 + $0x18] sm:$0xff] }
  0x79   : > { %784 = vmatpush.bf16.msra.mxu0 %v1831_v9  ;;  %1929 = vmatpush.bf16.msra.mxu3 %v1831_v9  ;;  %v655_v38 = vmul.f32 %v2663_v36, %v638_v34  ;;  %v656_v39 = vmul.f32 %v2663_v36, %v639_v35  ;;  %v652_v60 = vunpack.c.l.bf16 %v634_v57  ;;  %v653_v62 = vunpack.c.h.bf16 %v634_v57  ;;  %v1854_v35 = vld [vmem:[%s2634_s27 + $0x28] sm:$0xff]  ;;  %v1851_v55 = vld [vmem:[%s2634_s27 + $0x10] sm:$0xff]  ;;  %v1849_v57 = vld [vmem:[%s2634_s27] sm:$0xff] }
  0x7a   : > { %v667_v46 = vmul.f32 %v2663_v36, %v650_v40  ;;  %v668_v48 = vmul.f32 %v2663_v36, %v651_v42 }
  0x7b   : > { %v669_v2 = vmul.f32 %v2663_v36, %v652_v60  ;;  %v670_v4 = vmul.f32 %v2663_v36, %v653_v62 }
  0x7c   : > { %926 = vmatpush.bf16.msra.mxu1 %v1846_v24 }
  0x7d   : > { %785 = vmatpush.bf16.msra.mxu0 %v1830_v10  ;;  %1930 = vmatpush.bf16.msra.mxu3 %v1830_v10  ;;  %v642_v10 = vunpack.c.l.bf16 %v624_v6 }
  0x80   : > { %927 = vmatpush.bf16.msra.mxu1 %v1845_v25 }
  0x81   : > { %786 = vmatpush.bf16.msra.mxu0 %v1829_v11  ;;  %1931 = vmatpush.bf16.msra.mxu3 %v1829_v11  ;;  %v643_v11 = vunpack.c.h.bf16 %v624_v6 }
  0x84   : > { %928 = vmatpush.bf16.msra.mxu1 %v1844_v27 }
  0x85   : > { %787 = vmatpush.bf16.msra.mxu0 %v1828_v12  ;;  %1932 = vmatpush.bf16.msra.mxu3 %v1828_v12 }
  0x88   : > { %929 = vmatpush.bf16.msra.mxu1 %v1843_v29 }
  0x89   : > { %788 = vmatpush.bf16.msra.mxu0 %v1827_v13  ;;  %1933 = vmatpush.bf16.msra.mxu3 %v1827_v13  ;;  %v659_v13 = vmul.f32 %v2663_v36, %v642_v10 }
  0x8c   : > { %930 = vmatpush.bf16.msra.mxu1 %v1842_v30 }
  0x8d   : > { %789 = vmatpush.bf16.msra.mxu0 %v1826_v14  ;;  %1934 = vmatpush.bf16.msra.mxu3 %v1826_v14  ;;  %v660_v14 = vmul.f32 %v2663_v36, %v643_v11 }
  0x90   : > { %931 = vmatpush.bf16.msra.mxu1 %v1841_v31 }
  0x91   : > { %790 = vmatpush.bf16.msra.mxu0 %v1825_v15  ;;  %1935 = vmatpush.bf16.msra.mxu3 %v1825_v15 }
  0x94   : > { %791 = vmatmul.bf16.vlgmr.msra.gmra.mxu0 %v1833_v16  ;;  %821 = vmatmul.bf16.vlgmr.msra.gmra.mxu3 %v1839_v17 }
  0x95   : > { %1936 = vmatpush.bf16.msrb.mxu3 %v1848_v22 }
  0x99   : > { %1937 = vmatpush.bf16.msrb.mxu3 %v1847_v23 }
  0x9d   : > { %1938 = vmatpush.bf16.msrb.mxu3 %v1846_v24 }
  0xa1   : > { %1939 = vmatpush.bf16.msrb.mxu3 %v1845_v25 }
  0xa4   : > { %796 = vmatmul.bf16.gmra.mxu0 %v1834_v18  ;;  %826 = vmatmul.bf16.gmra.mxu3 %v1840_v19  ;;  %v626_v19 = vld [vmem:[#allocation2 + $0x18] sm:$0xff]  }
  0xa5   : > { %1940 = vmatpush.bf16.msrb.mxu3 %v1844_v27  ;;  %v645_v22 = vunpack.c.h.bf16 %v626_v19 }
  0xa7   : > { %v662_v24 = vmul.f32 %v2663_v36, %v645_v22 }
  0xa9   : > { %1941 = vmatpush.bf16.msrb.mxu3 %v1843_v29  ;;  %v1856_v29 = vld [vmem:[%s2634_s27 + $0x38] sm:$0xff] }
  0xaa   : > { %1065 = vmatpush.bf16.msra.mxu2 %v1856_v29 }
  0xad   : > { %1942 = vmatpush.bf16.msrb.mxu3 %v1842_v30  ;;  %v628_v30 = vld [vmem:[#allocation2 + $0x20] sm:$0xff]  }
  0xae   : > { %v647_v34 = vunpack.c.h.bf16 %v628_v30 }
  0xb1   : > { %1943 = vmatpush.bf16.msrb.mxu3 %v1841_v31  ;;  %v1855_v31 = vld [vmem:[%s2634_s27 + $0x30] sm:$0xff] }
  0xb2   : > { %1066 = vmatpush.bf16.msra.mxu2 %v1855_v31 }
  0xb4   : > { %801 = vmatmul.bf16.gmra.mxu0 %v1835_v20 }
  0xb5   : > { %1944 = vmatpush.bf16.msra.mxu3 %v1856_v29 }
  0xb6   : > { %1067 = vmatpush.bf16.msra.mxu2 %v1854_v35 }
  0xb9   : > { %1945 = vmatpush.bf16.msra.mxu3 %v1855_v31 }
  0xbd   : > { %1946 = vmatpush.bf16.msra.mxu3 %v1854_v35 }
  0xc4   : > { %806 = vmatmul.bf16.gmra.mxu0 %v1836_v21  ;;  %v644_v21 = vunpack.c.l.bf16 %v626_v19 }
  0xc6   : > { %v661_v23 = vmul.f32 %v2663_v36, %v644_v21 }
  0xd4   : > { %811 = vmatmul.bf16.gmra.mxu0 %v1837_v26 }
  0xe4   : > { %816 = vmatmul.bf16.gmra.mxu0 %v1838_v28 }
 0x111   : > { %v792_v33 = vpop.f32.mrf.mxu0 }
 0x112   : > { %v832_v44 = vadd.f32 %v792_v33, %v655_v38  ;;  %v646_v33 = vunpack.c.l.bf16 %v628_v30  ;;  %v664_v38 = vmul.f32 %v2663_v36, %v647_v34 }
 0x114   : > { %v663_v37 = vmul.f32 %v2663_v36, %v646_v33 }
 0x117   : > { %v822_v41 = vpop.f32.mrf.mxu3 }
 0x118   : > { %v844_v49 = vadd.f32 %v822_v41, %v667_v46 }
 0x119   : > { %v794_v43 = vpop.f32.mrf.mxu0 }
 0x11a   : > { %v833_v45 = vadd.f32 %v794_v43, %v656_v39  ;;  %v1853_v39 = vld [vmem:[%s2634_s27 + $0x20] sm:$0xff] }
 0x11b   : > { %1068 = vmatpush.bf16.msra.mxu2 %v1853_v39  ;;  %1947 = vmatpush.bf16.msra.mxu3 %v1853_v39 }
 0x11c   : > { %v848_v47 = vpack.c.bf16 %v833_v45, %v832_v44  ;;  %v630_v44 = vld [vmem:[#allocation2 + $0x28] sm:$0xff]  }
 0x11d   : > { %v648_v46 = vunpack.c.l.bf16 %v630_v44 }
 0x11e   : > { %932 = vmatmul.bf16.vlgmr.msra.gmra.mxu1 %v848_v47  ;;  %v649_v47 = vunpack.c.h.bf16 %v630_v44 }
 0x11f   : > { %v824_v51 = vpop.f32.mrf.mxu3  ;;  %1069 = vmatpush.bf16.msra.mxu2 %v1852_v54  ;;  %1948 = vmatpush.bf16.msra.mxu3 %v1852_v54 }
 0x120   : > { %v845_v52 = vadd.f32 %v824_v51, %v668_v48  ;;  %v665_v48 = vmul.f32 %v2663_v36, %v648_v46 }
 0x121   : > { %v797_v53 = vpop.f32.mrf.mxu0 }
 0x122   : > { %v854_v56 = vpack.c.bf16 %v845_v52, %v844_v49  ;;  %v834_v0 = vadd.f32 %v797_v53, %v657_v58  ;;  %v666_v49 = vmul.f32 %v2663_v36, %v649_v47  ;;  %v2066_v36 = vld [vmem:[%s580_s28] ss:$0 sm:$0xff] }
 0x123   : > { %1070 = vmatpush.bf16.msra.mxu2 %v1851_v55  ;;  %1949 = vmatpush.bf16.msra.mxu3 %v1851_v55 }
 0x124   : > { %962 = vmatmul.bf16.vlgmr.msrb.gmra.mxu3 %v854_v56  ;;  %v1850_v56 = vld [vmem:[%s2634_s27 + $0x8] sm:$0xff] }
 0x127   : > { %v827_v61 = vpop.f32.mrf.mxu3  ;;  %1071 = vmatpush.bf16.msra.mxu2 %v1850_v56  ;;  %1950 = vmatpush.bf16.msra.mxu3 %v1850_v56 }
 0x128   : > { %v846_v5 = vadd.f32 %v827_v61, %v669_v2 }
 0x129   : > { %v799_v63 = vpop.f32.mrf.mxu0 }
 0x12a   : > { %v835_v1 = vadd.f32 %v799_v63, %v658_v59 }
 0x12b   : > { %1072 = vmatpush.bf16.msra.mxu2 %v1849_v57  ;;  %1951 = vmatpush.bf16.msra.mxu3 %v1849_v57 }
 0x12c   : > { %v849_v3 = vpack.c.bf16 %v835_v1, %v834_v0 }
 0x12e   : > { %937 = vmatmul.bf16.gmra.mxu1 %v849_v3 }
 0x12f   : > { %v829_v7 = vpop.f32.mrf.mxu3 }
 0x130   : > { %v847_v8 = vadd.f32 %v829_v7, %v670_v4 }
 0x131   : > { %v802_v9 = vpop.f32.mrf.mxu0 }
 0x132   : > { %v855_v12 = vpack.c.bf16 %v847_v8, %v846_v5  ;;  %v836_v16 = vadd.f32 %v802_v9, %v659_v13 }
 0x134   : > { %967 = vmatmul.bf16.gmra.mxu3 %v855_v12 }
 0x139   : > { %v804_v15 = vpop.f32.mrf.mxu0 }
 0x13a   : > { %v837_v17 = vadd.f32 %v804_v15, %v660_v14 }
 0x13c   : > { %v850_v18 = vpack.c.bf16 %v837_v17, %v836_v16 }
 0x13e   : > { %942 = vmatmul.bf16.gmra.mxu1 %v850_v18 }
 0x141   : > { %v807_v20 = vpop.f32.mrf.mxu0 }
 0x142   : > { %v838_v26 = vadd.f32 %v807_v20, %v661_v23 }
 0x149   : > { %v809_v25 = vpop.f32.mrf.mxu0 }
 0x14a   : > { %v839_v27 = vadd.f32 %v809_v25, %v662_v24 }
 0x14c   : > { %v851_v28 = vpack.c.bf16 %v839_v27, %v838_v26 }
 0x14e   : > { %947 = vmatmul.bf16.gmra.mxu1 %v851_v28 }
 0x151   : > { %v812_v32 = vpop.f32.mrf.mxu0 }
 0x152   : > { %v840_v41 = vadd.f32 %v812_v32, %v663_v37 }
 0x159   : > { %v814_v40 = vpop.f32.mrf.mxu0 }
 0x15a   : > { %v841_v42 = vadd.f32 %v814_v40, %v664_v38 }
 0x15c   : > { %v852_v43 = vpack.c.bf16 %v841_v42, %v840_v41 }
 0x15e   : > { %952 = vmatmul.bf16.gmra.mxu1 %v852_v43 }
 0x161   : > { %v817_v45 = vpop.f32.mrf.mxu0 }
 0x162   : > { %v842_v51 = vadd.f32 %v817_v45, %v665_v48 }
 0x169   : > { %v819_v50 = vpop.f32.mrf.mxu0 }
 0x16a   : > { %v843_v52 = vadd.f32 %v819_v50, %v666_v49 }
 0x16c   : > { %v853_v53 = vpack.c.bf16 %v843_v52, %v842_v51  ;;  %v2067_v52 = vld [vmem:[%s583_s2] ss:$0 sm:$0xff] }
 0x16e   : > { %957 = vmatmul.bf16.gmra.mxu1 %v853_v53 }
 0x19b   : > { %v933_v58 = vpop.f32.mrf.mxu1 }
 0x19c   : > { %v934_v59 = vadd.f32 %v2066_v36, %v933_v58 }
 0x19e   : > { %v973_v62 = vmax.f32 %v934_v59, 0.0 }
 0x1a3   : > { %v935_v60 = vpop.f32.mrf.mxu1 }
 0x1a4   : > { %v936_v61 = vadd.f32 %v2066_v36, %v935_v60 }
 0x1a6   : > { %v974_v63 = vmax.f32 %v936_v61, 0.0 }
 0x1a7   : > { %v963_v0 = vpop.f32.mrf.mxu3 }
 0x1a8   : > { %v989_v1 = vpack.c.bf16 %v974_v63, %v973_v62  ;;  %v964_v3 = vadd.f32 %v2066_v36, %v963_v0 }
 0x1aa   : > { %1073 = vmatmul.bf16.vlgmr.msra.gmra.mxu2 %v989_v1  ;;  %v985_v5 = vmax.f32 %v964_v3, 0.0 }
 0x1ab   : > { %v938_v2 = vpop.f32.mrf.mxu1 }
 0x1ac   : > { %v939_v7 = vadd.f32 %v2066_v36, %v938_v2 }
 0x1ae   : > { %v975_v12 = vmax.f32 %v939_v7, 0.0 }
 0x1af   : > { %v965_v4 = vpop.f32.mrf.mxu3 }
 0x1b0   : > { %v966_v6 = vadd.f32 %v2066_v36, %v965_v4 }
 0x1b2   : > { %v986_v8 = vmax.f32 %v966_v6, 0.0 }
 0x1b3   : > { %v940_v9 = vpop.f32.mrf.mxu1 }
 0x1b4   : > { %v941_v10 = vadd.f32 %v2066_v36, %v940_v9  ;;  %v995_v11 = vpack.c.bf16 %v986_v8, %v985_v5 }
 0x1b6   : > { %v976_v13 = vmax.f32 %v941_v10, 0.0  ;;  %1103 = vmatmul.bf16.vlgmr.msra.gmra.mxu3 %v995_v11 }
 0x1b7   : > { %v968_v14 = vpop.f32.mrf.mxu3 }
 0x1b8   : > { %v990_v15 = vpack.c.bf16 %v976_v13, %v975_v12  ;;  %v969_v17 = vadd.f32 %v2066_v36, %v968_v14 }
 0x1ba   : > { %1078 = vmatmul.bf16.gmra.mxu2 %v990_v15  ;;  %v987_v19 = vmax.f32 %v969_v17, 0.0 }
 0x1bb   : > { %v943_v16 = vpop.f32.mrf.mxu1 }
 0x1bc   : > { %v944_v21 = vadd.f32 %v2066_v36, %v943_v16 }
 0x1be   : > { %v977_v26 = vmax.f32 %v944_v21, 0.0 }
 0x1bf   : > { %v970_v18 = vpop.f32.mrf.mxu3 }
 0x1c0   : > { %v971_v20 = vadd.f32 %v2066_v36, %v970_v18 }
 0x1c2   : > { %v988_v22 = vmax.f32 %v971_v20, 0.0 }
 0x1c3   : > { %v945_v23 = vpop.f32.mrf.mxu1 }
 0x1c4   : > { %v946_v24 = vadd.f32 %v2066_v36, %v945_v23  ;;  %v996_v25 = vpack.c.bf16 %v988_v22, %v987_v19 }
 0x1c6   : > { %v978_v27 = vmax.f32 %v946_v24, 0.0  ;;  %1108 = vmatmul.bf16.gmra.mxu3 %v996_v25 }
 0x1c8   : > { %v991_v28 = vpack.c.bf16 %v978_v27, %v977_v26 }
 0x1ca   : > { %1083 = vmatmul.bf16.gmra.mxu2 %v991_v28 }
 0x1cb   : > { %v948_v29 = vpop.f32.mrf.mxu1 }
 0x1cc   : > { %v949_v30 = vadd.f32 %v2066_v36, %v948_v29 }
 0x1ce   : > { %v979_v33 = vmax.f32 %v949_v30, 0.0 }
 0x1d3   : > { %v950_v31 = vpop.f32.mrf.mxu1 }
 0x1d4   : > { %v951_v32 = vadd.f32 %v2066_v36, %v950_v31 }
 0x1d6   : > { %v980_v34 = vmax.f32 %v951_v32, 0.0 }
 0x1d8   : > { %v992_v35 = vpack.c.bf16 %v980_v34, %v979_v33 }
 0x1da   : > { %1088 = vmatmul.bf16.gmra.mxu2 %v992_v35 }
 0x1db   : > { %v953_v37 = vpop.f32.mrf.mxu1 }
 0x1dc   : > { %v954_v38 = vadd.f32 %v2066_v36, %v953_v37 }
 0x1de   : > { %v981_v41 = vmax.f32 %v954_v38, 0.0 }
 0x1e3   : > { %v955_v39 = vpop.f32.mrf.mxu1 }
 0x1e4   : > { %v956_v40 = vadd.f32 %v2066_v36, %v955_v39 }
 0x1e6   : > { %v982_v42 = vmax.f32 %v956_v40, 0.0 }
 0x1e8   : > { %v993_v43 = vpack.c.bf16 %v982_v42, %v981_v41 }
 0x1ea   : > { %1093 = vmatmul.bf16.gmra.mxu2 %v993_v43 }
 0x1eb   : > { %v958_v44 = vpop.f32.mrf.mxu1 }
 0x1ec   : > { %v959_v45 = vadd.f32 %v2066_v36, %v958_v44 }
 0x1ee   : > { %v983_v48 = vmax.f32 %v959_v45, 0.0 }
 0x1f3   : > { %v960_v46 = vpop.f32.mrf.mxu1 }
 0x1f4   : > { %v961_v47 = vadd.f32 %v2066_v36, %v960_v46 }
 0x1f6   : > { %v984_v49 = vmax.f32 %v961_v47, 0.0 }
 0x1f8   : > { %v994_v50 = vpack.c.bf16 %v984_v49, %v983_v48 }
 0x1fa   : > { %1098 = vmatmul.bf16.gmra.mxu2 %v994_v50 }
 0x22d   : > { %v1074_v51 = vpop.f32.mrf.mxu2 }
 0x22e   : > { %v1075_v53 = vadd.f32 %v2067_v52, %v1074_v51 }
 0x230   : > { %v1114_v56 = vmax.f32 %v1075_v53, 0.0 }
 0x235   : > { %v1076_v54 = vpop.f32.mrf.mxu2 }
 0x236   : > { %v1077_v55 = vadd.f32 %v2067_v52, %v1076_v54 }
 0x238   : > { %v1115_v57 = vmax.f32 %v1077_v55, 0.0 }
 0x239   : > { %v1104_v58 = vpop.f32.mrf.mxu3 }
 0x23a   : > { %v1884_v59 = vpack.c.bf16 %v1115_v57, %v1114_v56  ;;  %v1105_v36 = vadd.f32 %v2067_v52, %v1104_v58 }
 0x23c   : > { %1885 = vst [vmem:[#allocation2] sm:$0xff] %v1884_v59   ;;  %v1126_v62 = vmax.f32 %v1105_v36, 0.0 }
 0x23d   : > { %v1079_v60 = vpop.f32.mrf.mxu2 }
 0x23e   : > { %v1080_v0 = vadd.f32 %v2067_v52, %v1079_v60 }
 0x240   : > { %v1116_v5 = vmax.f32 %v1080_v0, 0.0 }
 0x241   : > { %v1106_v61 = vpop.f32.mrf.mxu3 }
 0x242   : > { %v1107_v63 = vadd.f32 %v2067_v52, %v1106_v61 }
 0x244   : > { %v1127_v1 = vmax.f32 %v1107_v63, 0.0 }
 0x245   : > { %v1081_v2 = vpop.f32.mrf.mxu2 }
 0x246   : > { %v1082_v3 = vadd.f32 %v2067_v52, %v1081_v2  ;;  %v1914_v4 = vpack.c.bf16 %v1127_v1, %v1126_v62 }
 0x248   : > { %v1117_v6 = vmax.f32 %v1082_v3, 0.0  ;;  %1926 = vst [vmem:[#allocation2 + $0x30] sm:$0xff] %v1914_v4  }
 0x249   : > { %v1109_v7 = vpop.f32.mrf.mxu3 }
 0x24a   : > { %v1889_v8 = vpack.c.bf16 %v1117_v6, %v1116_v5  ;;  %v1110_v10 = vadd.f32 %v2067_v52, %v1109_v7 }
 0x24c   : > { %1921 = vst [vmem:[#allocation2 + $0x8] sm:$0xff] %v1889_v8   ;;  %v1128_v12 = vmax.f32 %v1110_v10, 0.0 }
 0x24d   : > { %v1084_v9 = vpop.f32.mrf.mxu2 }
 0x24e   : > { %v1085_v14 = vadd.f32 %v2067_v52, %v1084_v9 }
 0x250   : > { %v1118_v19 = vmax.f32 %v1085_v14, 0.0 }
 0x251   : > { %v1111_v11 = vpop.f32.mrf.mxu3 }
 0x252   : > { %v1112_v13 = vadd.f32 %v2067_v52, %v1111_v11 }
 0x254   : > { %v1129_v15 = vmax.f32 %v1112_v13, 0.0 }
 0x255   : > { %v1086_v16 = vpop.f32.mrf.mxu2 }
 0x256   : > { %v1087_v17 = vadd.f32 %v2067_v52, %v1086_v16  ;;  %v1919_v18 = vpack.c.bf16 %v1129_v15, %v1128_v12 }
 0x258   : > { %v1119_v20 = vmax.f32 %v1087_v17, 0.0  ;;  %1927 = vst [vmem:[#allocation2 + $0x38] sm:$0xff] %v1919_v18  }
 0x25a   : > { %v1894_v21 = vpack.c.bf16 %v1119_v20, %v1118_v19 }
 0x25c   : > { %1922 = vst [vmem:[#allocation2 + $0x10] sm:$0xff] %v1894_v21  }
 0x25d   : > { %v1089_v22 = vpop.f32.mrf.mxu2 }
 0x25e   : > { %v1090_v23 = vadd.f32 %v2067_v52, %v1089_v22 }
 0x260   : > { %v1120_v26 = vmax.f32 %v1090_v23, 0.0 }
 0x265   : > { %v1091_v24 = vpop.f32.mrf.mxu2 }
 0x266   : > { %v1092_v25 = vadd.f32 %v2067_v52, %v1091_v24 }
 0x268   : > { %v1121_v27 = vmax.f32 %v1092_v25, 0.0 }
 0x26a   : > { %v1899_v28 = vpack.c.bf16 %v1121_v27, %v1120_v26 }
 0x26c   : > { %1923 = vst [vmem:[#allocation2 + $0x18] sm:$0xff] %v1899_v28  }
 0x26d   : > { %v1094_v29 = vpop.f32.mrf.mxu2 }
 0x26e   : > { %v1095_v30 = vadd.f32 %v2067_v52, %v1094_v29 }
 0x270   : > { %v1122_v33 = vmax.f32 %v1095_v30, 0.0 }
 0x275   : > { %v1096_v31 = vpop.f32.mrf.mxu2 }
 0x276   : > { %v1097_v32 = vadd.f32 %v2067_v52, %v1096_v31 }
 0x278   : > { %v1123_v34 = vmax.f32 %v1097_v32, 0.0 }
 0x27a   : > { %v1904_v35 = vpack.c.bf16 %v1123_v34, %v1122_v33 }
 0x27c   : > { %1924 = vst [vmem:[#allocation2 + $0x20] sm:$0xff] %v1904_v35  }
 0x27d   : > { %v1099_v37 = vpop.f32.mrf.mxu2 }
 0x27e   : > { %v1100_v38 = vadd.f32 %v2067_v52, %v1099_v37 }
 0x280   : > { %v1124_v41 = vmax.f32 %v1100_v38, 0.0 }
 0x285   : > { %v1101_v39 = vpop.f32.mrf.mxu2 }
 0x286   : > { %v1102_v40 = vadd.f32 %v2067_v52, %v1101_v39 }
 0x288   : > { %v1125_v42 = vmax.f32 %v1102_v40, 0.0  ;;  %1165 = sbr.rel (%p1722_p1) target bundleno = 1085 (0x43d), region = 108 }
 0x28a   : > { %v1909_v43 = vpack.c.bf16 %v1125_v42, %v1124_v41 }
 0x28c   : > { %1925 = vst [vmem:[#allocation2 + $0x28] sm:$0xff] %v1909_v43  }
 0x28d   : > { %v1864_v44 = vld [vmem:[#allocation2 + $0x38] sm:$0xff]  ;;  %v1863_v45 = vld [vmem:[#allocation2 + $0x30] sm:$0xff]  ;;  %v1861_v50 = vld [vmem:[#allocation2 + $0x20] sm:$0xff] }
 0x28e   : > { %1231 = vmatpush.bf16.msra.mxu0 %v1864_v44  ;;  %v1872_v46 = vld [vmem:[#allocation14 + $0x38] sm:$0xff]  ;;  %v1871_v47 = vld [vmem:[#allocation14 + $0x30] sm:$0xff]  ;;  %v1870_v49 = vld [vmem:[#allocation14 + $0x28] sm:$0xff] }
 0x28f   : > { %1313 = vmatpush.bf16.msra.mxu1 %v1872_v46  ;;  %v1869_v51 = vld [vmem:[#allocation14 + $0x20] sm:$0xff]  ;;  %v1860_v52 = vld [vmem:[#allocation2 + $0x18] sm:$0xff]  ;;  %v1859_v54 = vld [vmem:[#allocation2 + $0x10] sm:$0xff] }
 0x290   : > { %v1868_v53 = vld [vmem:[#allocation14 + $0x18] sm:$0xff]  ;;  %v1867_v55 = vld [vmem:[#allocation14 + $0x10] sm:$0xff]  ;;  %v1858_v56 = vld [vmem:[#allocation2 + $0x8] sm:$0xff] }
 0x291   : > { %v1866_v57 = vld [vmem:[#allocation14 + $0x8] sm:$0xff]  ;;  %v1857_v58 = vld [vmem:[#allocation2] sm:$0xff]  ;;  %v1879_v61 = vld [vmem:[#allocation16 + $0x30] sm:$0xff] }
 0x292   : > { %1232 = vmatpush.bf16.msra.mxu0 %v1863_v45  ;;  %v1166_v59 = vld [vmem:[#allocation10] sm:$0xf]  ;;  %v1865_v60 = vld [vmem:[#allocation14] sm:$0xff]  ;;  %v1878_v62 = vld [vmem:[#allocation16 + $0x28] sm:$0xff] }
 0x293   : > { %v1862_v48 = vld [vmem:[#allocation2 + $0x28] sm:$0xff]  ;;  %1314 = vmatpush.bf16.msra.mxu1 %v1871_v47  ;;  %v1880_v36 = vld [vmem:[#allocation16 + $0x38] sm:$0xff]  ;;  %v1875_v1 = vld [vmem:[#allocation16 + $0x10] sm:$0xff] }
 0x294   : > { %1396 = vmatpush.bf16.msra.mxu2 %v1880_v36  ;;  %v1877_v63 = vld [vmem:[#allocation16 + $0x20] sm:$0xff]  ;;  %v1876_v0 = vld [vmem:[#allocation16 + $0x18] sm:$0xff]  ;;  %v1874_v5 = vld [vmem:[#allocation16 + $0x8] sm:$0xff] }
 0x295   : > { %v1873_v6 = vld [vmem:[#allocation16] sm:$0xff]  ;;  %v2068_v7 = vld [vmem:[%s2732_s9] ss:$0 sm:$0xff] }
 0x296   : > { %1233 = vmatpush.bf16.msra.mxu0 %v1862_v48  ;;  %v2069_v13 = vld [vmem:[%s2734_s11] ss:$0 sm:$0xff] }
 0x297   : > { %1315 = vmatpush.bf16.msra.mxu1 %v1870_v49 }
 0x298   : > { %1397 = vmatpush.bf16.msra.mxu2 %v1879_v61 }
 0x29a   : > { %1234 = vmatpush.bf16.msra.mxu0 %v1861_v50 }
 0x29b   : > { %1316 = vmatpush.bf16.msra.mxu1 %v1869_v51 }
 0x29c   : > { %1398 = vmatpush.bf16.msra.mxu2 %v1878_v62 }
 0x29e   : > { %1235 = vmatpush.bf16.msra.mxu0 %v1860_v52 }
 0x29f   : > { %1317 = vmatpush.bf16.msra.mxu1 %v1868_v53 }
 0x2a0   : > { %1399 = vmatpush.bf16.msra.mxu2 %v1877_v63 }
 0x2a2   : > { %1236 = vmatpush.bf16.msra.mxu0 %v1859_v54 }
 0x2a3   : > { %1318 = vmatpush.bf16.msra.mxu1 %v1867_v55 }
 0x2a4   : > { %1400 = vmatpush.bf16.msra.mxu2 %v1876_v0 }
 0x2a6   : > { %1237 = vmatpush.bf16.msra.mxu0 %v1858_v56 }
 0x2a7   : > { %1319 = vmatpush.bf16.msra.mxu1 %v1866_v57 }
 0x2a8   : > { %1401 = vmatpush.bf16.msra.mxu2 %v1875_v1 }
 0x2aa   : > { %1238 = vmatpush.bf16.msra.mxu0 %v1857_v58 }
 0x2ab   : > { %1320 = vmatpush.bf16.msra.mxu1 %v1865_v60 }
 0x2ac   : > { %1402 = vmatpush.bf16.msra.mxu2 %v1874_v5 }
 0x2ad   : > { %1239 = vmatmul.bf16.vlgmr.msra.gmra.mxu0 %v1166_v59 }
 0x2b0   : > { %1403 = vmatpush.bf16.msra.mxu2 %v1873_v6 }
 0x32a   : > { %v1240_v2 = vpop.f32.mrf.mxu0 }
 0x32b   : > { %v1244_v3 = vpack.c.bf16 %v1240_v2, %v1240_v2 }
 0x32d   : > { %1321 = vmatmul.bf16.vlgmr.msra.gmra.mxu1 %v1244_v3 }
 0x332   : > { %v1242_v4 = vpop.f32.mrf.mxu0 }
 0x3aa   : > { %v1322_v8 = vpop.f32.mrf.mxu1 }
 0x3ab   : > { %v1323_v9 = vadd.f32 %v2068_v7, %v1322_v8 }
 0x3ad   : > { %v1326_v10 = vmax.f32 %v1323_v9, 0.0 }
 0x3af   : > { %v1327_v11 = vpack.c.bf16 %v1326_v10, %v1326_v10 }
 0x3b1   : > { %1404 = vmatmul.bf16.vlgmr.msra.gmra.mxu2 %v1327_v11 }
 0x3b2   : > { %v1324_v12 = vpop.f32.mrf.mxu1 }
 0x434   : > { %v1405_v14 = vpop.f32.mrf.mxu2 }
 0x435   : > { %v1406_v15 = vadd.f32 %v2069_v13, %v1405_v14 }
 0x437   : > { %1409 = vst [vmem:[#allocation17] sm:$0xff] %v1406_v15 }
 0x43c   : > { %v1407_v16 = vpop.f32.mrf.mxu2 }
 0x43d PF: > { %p2023_p3 = scmp.eq.s32.totalorder %s2474_s25, 2  ;;  %s2387_s12 = smov [#allocation17]  }
 0x43e   : > { %s1416_s29 = sshll.u32 %s2387_s12, 4  ;;  %s2761_s13 = sld [smem:[#allocation31_spill]]  ;;  %s1417_s29 = int_to_ptr.vmem [resolvable:$true] %s1416_s29 }
 0x444   : > { %s1418_s19 = sshll.u32 %s2761_s13, 4  ;;  %s1419_s19 = int_to_ptr.hbm [resolvable:$true] %s1418_s19 }
 0x445   : > { %1981 = dma.vmem_to_hbm [thread:$0]  (%p2023_p3), %s1417_s29, 128, %s1419_s19, [#allocation5]  }
 0x446   : > { %2360 = dma.done.wait (%p2023_p3), [#allocation5], 128  }
 0x447   : > { %2362 = vsyncadd (%p2023_p3), [#allocation5], 4294967168 }
 0x448 PF: > { %s2762_s24 = sld [smem:[#allocation25_spill]]  ;;  %s2765_s21 = smov %s2369_s22 }
 0x449   : > { %s2763_s26 = sld [smem:[#allocation24_spill]] }
 0x44a   : > { %s2764_s23 = sld [smem:[#allocation26_spill]] }
 0x44e   : > { %p27_p6 = scmp.ge.s32.totalorder %s2762_s24, 5  }
 0x44f   : > { %s2766_s22 = smov %s2763_s26 }
 0x450   :  { %29 = sbr.rel (!%p27_p6) target bundleno = 14 (0xe), region = 156 }
 0x455   :  { %1432 = vsyncpa [#allocation4], 1 }
 0x456   :  { %1434 = vsyncpa [#allocation4 + $0x1], 1 }
 0x457   :  { %1435 = vsyncpa [#allocation9], 1 }
 0x458   :  { %1436 = vsyncpa [#allocation12], 1 }
 0x459   :  { %1438 = vsyncpa [#allocation12 + $0x1], 1 }
 0x45a   :  { %1439 = vsyncpa [#allocation15], 1 }
 0x45b   :  { %1440 = vsyncpa [#allocation5], 1 }
 0x45c   :  { %1442 = vsyncpa [#allocation5 + $0x1], 1 }
 0x45d   :  { %1443 = vsyncpa [#allocation6], 1 }
 0x45e   :  { %1445 = vsyncpa [#allocation6 + $0x1], 1 }

</bundles_post_ra>
